<compile_context>
chip_gen: v7x
topology: tpu7x:2x2x1
jax: 0.10.0
libtpu: 0.0.40
codegen_flags: <defaults>
</compile_context>

<pallas_src>
import functools

import jax
import jax.numpy as jnp
from jax import lax
from jax.experimental import pallas as pl
from jax.experimental.pallas import tpu as pltpu


_NEG_BIG = -1e30   # finite "minus infinity" sentinel (plain Python float -> literal,
                   # avoids captured-constant trace error and 0*inf NaNs)


def _attn_pooling_kernel(batch_ref, h_ref, w1t_ref, w2_ref, o_ref,
                         m_ref, l_ref, *, num_graphs, mxu_dtype, approx_recip):
    i = pl.program_id(0)

    @pl.when(i == 0)
    def _init():
        m_ref[...] = jnp.full(m_ref.shape, _NEG_BIG, jnp.float32)
        l_ref[...] = jnp.zeros(l_ref.shape, jnp.float32)
        o_ref[...] = jnp.zeros(o_ref.shape, jnp.float32)

    # ---- attention logits for this node tile --------------------------------
    h_mx = h_ref[...].astype(mxu_dtype)                            # (TN, F_in)
    z1 = jnp.dot(h_mx, w1t_ref[...],                               # (TN, hid)  natural MXU
                 preferred_element_type=jnp.float32)
    a1 = jnp.tanh(z1).astype(mxu_dtype)                            # f32 tanh -> bf16 operand
    # (OUT, TN) = w2 @ a1^T : contract the shared hid dim of both operands (trans_b)
    logits_t = lax.dot_general(w2_ref[...], a1, (((1,), (1,)), ((), ())),
                               preferred_element_type=jnp.float32)  # (1, TN)

    # ---- segment membership, transposed / lane-major: (G, TN) ---------------
    batch_row = batch_ref[...]                                     # (1, TN) int32
    g_iota = lax.broadcasted_iota(jnp.int32,
                                  (num_graphs, batch_row.shape[1]), 0)
    member = batch_row == g_iota                                   # (G, TN) bool
    member_f = member.astype(jnp.float32)

    # ---- online segment-softmax update ---------------------------------------
    masked = jnp.where(member, logits_t, _NEG_BIG)                 # (G, TN)
    tile_max = jnp.max(masked, axis=1, keepdims=True)              # (G, 1)
    m_prev = m_ref[...]                                            # (G, 1)
    m_new = jnp.maximum(m_prev, tile_max)
    alpha = jnp.exp(m_prev - m_new)                                # (G, 1), <= 1

    # gather each node's running segment max (each node belongs to exactly one graph)
    node_max = jnp.sum(member_f * m_new, axis=0, keepdims=True)    # (1, TN)
    p = member_f * jnp.exp(logits_t - node_max)                    # (G, TN), S folded in

    m_ref[...] = m_new
    l_ref[...] = alpha * l_ref[...] + jnp.sum(p, axis=1, keepdims=True)
    # scatter-add of attention-weighted features: natural (G,TN)@(TN,F_in) MXU matmul
    o_ref[...] = alpha * o_ref[...] + jnp.dot(
        p.astype(mxu_dtype), h_mx, preferred_element_type=jnp.float32)

    @pl.when(i == pl.num_programs(0) - 1)
    def _finalize():
        l = l_ref[...]
        l_safe = jnp.where(l > 0.0, l, 1.0)        # empty graphs -> zero rows, not NaN
        o_ref[...] = o_ref[...] * pl.reciprocal(l_safe, approx=approx_recip)


def _round_up(x, m):
    return ((x + m - 1) // m) * m


def attn_pooling(H, batch, w1, b1, w2, *, size, tile_n=512, mxu_dtype=jnp.bfloat16):
    """Pallas TPU implementation of AttnPooling.forward.

    H:     (N, in_feats) float32 node features
    batch: (N,) int graph id per node, values in [0, size)
    w1:    (hid_feats, in_feats); b1: (hid_feats,) [unused in forward]; w2: (out_feats, hid_feats)
    size:  static number of graphs (required: avoids a device->host sync and does not
           assume `batch` is sorted).
    """
    del b1  # defined by the module, never used in forward()
    if size is None:
        raise ValueError("`size` must be provided as a static Python int.")
    size = int(size)

    N, f_in = H.shape
    hid, f_in_w = w1.shape
    out_feats = w2.shape[0]
    assert f_in_w == f_in and w2.shape[1] == hid
    if out_feats != 1:
        # TODO(synk): out_feats > 1 only broadcasts in the PyTorch forward when
        # out_feats == in_feats; that variant is not implemented here.
        raise NotImplementedError("Pallas AttnPooling kernel supports out_feats == 1.")

    # ---- node-axis tiling / padding ------------------------------------------
    n_pad = _round_up(max(N, 8), 8)
    if n_pad <= tile_n:
        tn = n_pad                                   # single tile == full (padded) array
    else:
        tn = _round_up(tile_n, 128)                  # (1, tn) batch block needs lane multiple
        n_pad = _round_up(N, tn)
    num_tiles = n_pad // tn

    batch_row = batch.astype(jnp.int32).reshape(1, N)
    h_in = H.astype(jnp.float32)
    if n_pad != N:
        pad = n_pad - N
        h_in = jnp.pad(h_in, ((0, pad), (0, 0)))
        # sentinel graph id == size -> padded nodes belong to no graph
        batch_row = jnp.pad(batch_row, ((0, 0), (0, pad)), constant_values=size)

    # pre-transpose / pre-cast the (tiny) weights once, outside the kernel
    w1t = w1.T.astype(mxu_dtype)                     # (F_in, hid)
    w2c = w2.astype(mxu_dtype)                       # (1, hid)
    approx_recip = bool(jnp.dtype(mxu_dtype) != jnp.dtype(jnp.float32))

    kernel = functools.partial(_attn_pooling_kernel, num_graphs=size,
                               mxu_dtype=mxu_dtype, approx_recip=approx_recip)

    cost = pl.CostEstimate(
        flops=2 * n_pad * (f_in * hid + hid + size * f_in),
        transcendentals=n_pad * (hid + 2),
        bytes_accessed=(h_in.size * 4 + batch_row.size * 4
                        + w1t.size * w1t.dtype.itemsize
                        + w2c.size * w2c.dtype.itemsize
                        + size * f_in * 4),
    )

    return pl.pallas_call(
        kernel,
        out_shape=jax.ShapeDtypeStruct((size, f_in), jnp.float32),
        grid=(num_tiles,),
        in_specs=[
            pl.BlockSpec((1, tn), lambda i: (0, i)),       # graph ids (lane-major row)
            pl.BlockSpec((tn, f_in), lambda i: (i, 0)),    # H node tile
            pl.BlockSpec((f_in, hid), lambda i: (0, 0)),   # w1^T (resident)
            pl.BlockSpec((1, hid), lambda i: (0, 0)),      # w2   (resident)
        ],
        out_specs=pl.BlockSpec((size, f_in), lambda i: (0, 0)),   # resident accumulator
        scratch_shapes=[pltpu.VMEM((size, 1), jnp.float32),       # running seg max m
                        pltpu.VMEM((size, 1), jnp.float32)],      # running seg sum l
        compiler_params=pltpu.CompilerParams(
            dimension_semantics=("arbitrary",),    # output accumulates over node tiles
            vmem_limit_bytes=32 * 1024 * 1024),
        cost_estimate=cost,
    )(batch_row, h_in, w1t, w2c)


def _glorot(key, shape):
    fan_out, fan_in = shape
    limit = (6.0 / (fan_in + fan_out)) ** 0.5
    return jax.random.uniform(key, shape, jnp.float32, -limit, limit)


def _reference(H, batch, w1, w2, size):
    """Pure-JAX mirror of the PyTorch forward (f32, highest matmul precision)."""
    x = jnp.tanh(jnp.dot(w1, H.T, precision=lax.Precision.HIGHEST))
    x = jnp.dot(w2, x, precision=lax.Precision.HIGHEST)
    logits = x.T                                               # (N, out)
    seg_max = jax.ops.segment_max(logits, batch, num_segments=size)
    e = jnp.exp(logits - seg_max[batch])
    seg_sum = jax.ops.segment_sum(e, batch, num_segments=size)
    S = e / seg_sum[batch]
    return jax.ops.segment_sum(S * H, batch, num_segments=size)


if __name__ == "__main__":
    root = jax.random.PRNGKey(0)

    def run_case(key, N, in_feats, hid_feats, num_graphs, batch, tile_n):
        k_h, k_w1, k_w2 = jax.random.split(key, 3)
        H = jax.random.normal(k_h, (N, in_feats), jnp.float32)
        w1 = _glorot(k_w1, (hid_feats, in_feats))
        b1 = jnp.zeros((hid_feats,), jnp.float32)   # module param, unused in forward
        w2 = _glorot(k_w2, (1, hid_feats))
        ref = _reference(H, batch, w1, w2, num_graphs)

        # exact-math path (f32 MXU operands): tight semantic check
        out32 = jax.block_until_ready(
            attn_pooling(H, batch, w1, b1, w2, size=num_graphs,
                         tile_n=tile_n, mxu_dtype=jnp.float32))
        assert out32.shape == (num_graphs, in_feats)
        assert bool(jnp.allclose(out32, ref, atol=1e-4, rtol=1e-4)), (out32, ref)

        # perf path (bf16 MXU operands, f32 accumulation): looser tolerance
        out16 = jax.block_until_ready(
            attn_pooling(H, batch, w1, b1, w2, size=num_graphs,
                         tile_n=tile_n, mxu_dtype=jnp.bfloat16))
        assert bool(jnp.allclose(out16, ref, atol=5e-2, rtol=5e-2)), (out16, ref)

    # case 1: small, single tile (N=16 nodes, 2 graphs, in=16, hid=32, out=1)
    k1, k2, kb = jax.random.split(root, 3)
    N1 = 16
    batch1 = jnp.concatenate([jnp.zeros((N1 // 2,), jnp.int32),
                              jnp.ones((N1 - N1 // 2,), jnp.int32)])
    run_case(k1, N1, 16, 32, 2, batch1, tile_n=512)

    # case 2: multi-tile grid + node padding + unsorted batch + one empty graph
    N2, G2 = 300, 6
    batch2 = jax.random.randint(kb, (N2,), 0, G2 - 1).astype(jnp.int32)  # graph 5 is empty
    run_case(k2, N2, 128, 64, G2, batch2, tile_n=128)

    print("KERNEL_OK")
</pallas_src>

<mosaic_0001>
module attributes {stable_mosaic.version = 11 : i64} {
  func.func @_attn_pooling_kernel(%arg0: i32, %arg1: memref<1x16xi32, #tpu.memory_space<vmem>>, %arg2: memref<16x16xf32, #tpu.memory_space<vmem>>, %arg3: memref<16x32xf32, #tpu.memory_space<vmem>>, %arg4: memref<1x32xf32, #tpu.memory_space<vmem>>, %arg5: memref<2x16xf32, #tpu.memory_space<vmem>>, %arg6: memref<2x1xf32, #tpu.memory_space<vmem>>, %arg7: memref<2x1xf32, #tpu.memory_space<vmem>>) attributes {dimension_semantics = [#tpu.dimension_semantics<arbitrary>], iteration_bounds = array<i64: 1>, scalar_prefetch = 0 : i64, scratch_operands = 2 : i64, tpu.core_type = #tpu.core_type<tc>, window_params = [{transform_indices = @transform_0, window_bounds = array<i64: 1, 16>}, {transform_indices = @transform_1, window_bounds = array<i64: 16, 16>}, {pipeline_mode = #tpu.pipeline_mode<synchronous>, transform_indices = @transform_2, window_bounds = array<i64: 16, 32>}, {pipeline_mode = #tpu.pipeline_mode<synchronous>, transform_indices = @transform_3, window_bounds = array<i64: 1, 32>}, {pipeline_mode = #tpu.pipeline_mode<synchronous>, transform_indices = @transform_4, window_bounds = array<i64: 2, 16>}]} {
    %c0_i32 = arith.constant 0 : i32
    %0 = arith.cmpi eq, %arg0, %c0_i32 : i32
    %1 = arith.extui %0 : i1 to i32
    %c0_i32_0 = arith.constant 0 : i32
    %2 = arith.cmpi ne, %1, %c0_i32_0 : i32
    scf.if %2 {
      %cst_28 = arith.constant -1.000000e+30 : f32
      %49 = vector.broadcast %cst_28 : f32 to vector<2x1xf32>
      %c0_29 = arith.constant 0 : index
      %c0_30 = arith.constant 0 : index
      %50 = vector.load %arg6[%c0_29, %c0_30] : memref<2x1xf32, #tpu.memory_space<vmem>>, vector<2x1xf32>
      tpu.vector_store %arg6[%c0_29, %c0_30], %49 {strides = array<i32>} : memref<2x1xf32, #tpu.memory_space<vmem>>, vector<2x1xf32>,
      %cst_31 = arith.constant 0.000000e+00 : f32
      %51 = vector.broadcast %cst_31 : f32 to vector<2x1xf32>
      %c0_32 = arith.constant 0 : index
      %c0_33 = arith.constant 0 : index
      %52 = vector.load %arg7[%c0_32, %c0_33] : memref<2x1xf32, #tpu.memory_space<vmem>>, vector<2x1xf32>
      tpu.vector_store %arg7[%c0_32, %c0_33], %51 {strides = array<i32>} : memref<2x1xf32, #tpu.memory_space<vmem>>, vector<2x1xf32>,
      %cst_34 = arith.constant 0.000000e+00 : f32
      %53 = vector.broadcast %cst_34 : f32 to vector<2x16xf32>
      %c0_35 = arith.constant 0 : index
      %c0_36 = arith.constant 0 : index
      %54 = vector.load %arg5[%c0_35, %c0_36] : memref<2x16xf32, #tpu.memory_space<vmem>>, vector<2x16xf32>
      tpu.vector_store %arg5[%c0_35, %c0_36], %53 {strides = array<i32>} : memref<2x16xf32, #tpu.memory_space<vmem>>, vector<2x16xf32>,
    } else {
    }
    %c0 = arith.constant 0 : index
    %c0_1 = arith.constant 0 : index
    %3 = vector.load %arg2[%c0, %c0_1] : memref<16x16xf32, #tpu.memory_space<vmem>>, vector<16x16xf32>
    %c0_2 = arith.constant 0 : index
    %c0_3 = arith.constant 0 : index
    %4 = vector.load %arg3[%c0_2, %c0_3] : memref<16x32xf32, #tpu.memory_space<vmem>>, vector<16x32xf32>
    %cst = arith.constant dense<0.000000e+00> : vector<16x32xf32>
    %5 = tpu.matmul %3, %4, %cst {dimension_numbers = #tpu.dot_dimension_numbers<[1], [0], [0], [1], [0, 0, 1, 1], [], []>} : vector<16x16xf32>, vector<16x32xf32>, vector<16x32xf32> -> vector<16x32xf32>
    %6 = math.tanh %5 : vector<16x32xf32>
    %c0_4 = arith.constant 0 : index
    %c0_5 = arith.constant 0 : index
    %7 = vector.load %arg4[%c0_4, %c0_5] : memref<1x32xf32, #tpu.memory_space<vmem>>, vector<1x32xf32>
    %cst_6 = arith.constant dense<0.000000e+00> : vector<1x16xf32>
    %8 = tpu.matmul %7, %6, %cst_6 {dimension_numbers = #tpu.dot_dimension_numbers<[1], [1], [0], [0], [0, 0, 1, 0], [], []>} : vector<1x32xf32>, vector<16x32xf32>, vector<1x16xf32> -> vector<1x16xf32>
    %c0_7 = arith.constant 0 : index
    %c0_8 = arith.constant 0 : index
    %9 = vector.load %arg1[%c0_7, %c0_8] : memref<1x16xi32, #tpu.memory_space<vmem>>, vector<1x16xi32>
    %10 = tpu.iota {dimensions = array<i32: 0>} : vector<2x16xi32>
    %11 = vector.broadcast %9 : vector<1x16xi32> to vector<2x16xi32>
    %12 = arith.cmpi eq, %11, %10 : vector<2x16xi32>
    %13 = arith.extui %12 : vector<2x16xi1> to vector<2x16xi32>
    %14 = arith.sitofp %13 : vector<2x16xi32> to vector<2x16xf32>
    %cst_9 = arith.constant -1.000000e+30 : f32
    %15 = vector.shape_cast %8 : vector<1x16xf32> to vector<1x16xf32>
    %16 = vector.broadcast %15 : vector<1x16xf32> to vector<2x16xf32>
    %17 = vector.broadcast %cst_9 : f32 to vector<2x16xf32>
    %18 = arith.select %12, %16, %17 : vector<2x16xi1>, vector<2x16xf32>
    %cst_10 = arith.constant dense<0xFF800000> : vector<2xf32>
    %19 = vector.multi_reduction <maximumf>, %18, %cst_10 [1] : vector<2x16xf32> to vector<2xf32>
    %20 = vector.shape_cast %19 : vector<2xf32> to vector<2x1xf32>
    %c0_11 = arith.constant 0 : index
    %c0_12 = arith.constant 0 : index
    %21 = vector.load %arg6[%c0_11, %c0_12] : memref<2x1xf32, #tpu.memory_space<vmem>>, vector<2x1xf32>
    %22 = arith.maximumf %21, %20 : vector<2x1xf32>
    %23 = arith.subf %21, %22 : vector<2x1xf32>
    %24 = math.exp %23 : vector<2x1xf32>
    %25 = vector.broadcast %22 : vector<2x1xf32> to vector<2x16xf32>
    %26 = arith.mulf %14, %25 : vector<2x16xf32>
    %cst_13 = arith.constant dense<0.000000e+00> : vector<16xf32>
    %27 = vector.multi_reduction <add>, %26, %cst_13 [0] : vector<2x16xf32> to vector<16xf32>
    %28 = vector.shape_cast %27 : vector<16xf32> to vector<1x16xf32>
    %29 = arith.subf %8, %28 : vector<1x16xf32>
    %30 = math.exp %29 : vector<1x16xf32>
    %31 = vector.broadcast %30 : vector<1x16xf32> to vector<2x16xf32>
    %32 = arith.mulf %14, %31 : vector<2x16xf32>
    %c0_14 = arith.constant 0 : index
    %c0_15 = arith.constant 0 : index
    %33 = vector.load %arg6[%c0_14, %c0_15] : memref<2x1xf32, #tpu.memory_space<vmem>>, vector<2x1xf32>
    tpu.vector_store %arg6[%c0_14, %c0_15], %22 {strides = array<i32>} : memref<2x1xf32, #tpu.memory_space<vmem>>, vector<2x1xf32>,
    %c0_16 = arith.constant 0 : index
    %c0_17 = arith.constant 0 : index
    %34 = vector.load %arg7[%c0_16, %c0_17] : memref<2x1xf32, #tpu.memory_space<vmem>>, vector<2x1xf32>
    %35 = arith.mulf %24, %34 : vector<2x1xf32>
    %cst_18 = arith.constant dense<0.000000e+00> : vector<2xf32>
    %36 = vector.multi_reduction <add>, %32, %cst_18 [1] : vector<2x16xf32> to vector<2xf32>
    %37 = vector.shape_cast %36 : vector<2xf32> to vector<2x1xf32>
    %38 = arith.addf %35, %37 : vector<2x1xf32>
    %c0_19 = arith.constant 0 : index
    %c0_20 = arith.constant 0 : index
    %39 = vector.load %arg7[%c0_19, %c0_20] : memref<2x1xf32, #tpu.memory_space<vmem>>, vector<2x1xf32>
    tpu.vector_store %arg7[%c0_19, %c0_20], %38 {strides = array<i32>} : memref<2x1xf32, #tpu.memory_space<vmem>>, vector<2x1xf32>,
    %c0_21 = arith.constant 0 : index
    %c0_22 = arith.constant 0 : index
    %40 = vector.load %arg5[%c0_21, %c0_22] : memref<2x16xf32, #tpu.memory_space<vmem>>, vector<2x16xf32>
    %41 = vector.broadcast %24 : vector<2x1xf32> to vector<2x16xf32>
    %42 = arith.mulf %41, %40 : vector<2x16xf32>
    %cst_23 = arith.constant dense<0.000000e+00> : vector<2x16xf32>
    %43 = tpu.matmul %32, %3, %cst_23 {dimension_numbers = #tpu.dot_dimension_numbers<[1], [0], [0], [1], [0, 0, 1, 1], [], []>} : vector<2x16xf32>, vector<16x16xf32>, vector<2x16xf32> -> vector<2x16xf32>
    %44 = arith.addf %42, %43 : vector<2x16xf32>
    %c0_24 = arith.constant 0 : index
    %c0_25 = arith.constant 0 : index
    %45 = vector.load %arg5[%c0_24, %c0_25] : memref<2x16xf32, #tpu.memory_space<vmem>>, vector<2x16xf32>
    tpu.vector_store %arg5[%c0_24, %c0_25], %44 {strides = array<i32>} : memref<2x16xf32, #tpu.memory_space<vmem>>, vector<2x16xf32>,
    %c0_i32_26 = arith.constant 0 : i32
    %46 = arith.cmpi eq, %arg0, %c0_i32_26 : i32
    %47 = arith.extui %46 : i1 to i32
    %c0_i32_27 = arith.constant 0 : i32
    %48 = arith.cmpi ne, %47, %c0_i32_27 : i32
    scf.if %48 {
      %c0_28 = arith.constant 0 : index
      %c0_29 = arith.constant 0 : index
      %49 = vector.load %arg7[%c0_28, %c0_29] : memref<2x1xf32, #tpu.memory_space<vmem>>, vector<2x1xf32>
      %cst_30 = arith.constant 0.000000e+00 : f32
      %50 = vector.broadcast %cst_30 : f32 to vector<2x1xf32>
      %51 = arith.cmpf ogt, %49, %50 : vector<2x1xf32>
      %cst_31 = arith.constant 1.000000e+00 : f32
      %52 = vector.broadcast %cst_31 : f32 to vector<2x1xf32>
      %53 = arith.select %51, %49, %52 : vector<2x1xi1>, vector<2x1xf32>
      %c0_32 = arith.constant 0 : index
      %c0_33 = arith.constant 0 : index
      %54 = vector.load %arg5[%c0_32, %c0_33] : memref<2x16xf32, #tpu.memory_space<vmem>>, vector<2x16xf32>
      %55 = tpu.reciprocal %53 : vector<2x1xf32> -> vector<2x1xf32>
      %56 = vector.broadcast %55 : vector<2x1xf32> to vector<2x16xf32>
      %57 = arith.mulf %54, %56 : vector<2x16xf32>
      %c0_34 = arith.constant 0 : index
      %c0_35 = arith.constant 0 : index
      %58 = vector.load %arg5[%c0_34, %c0_35] : memref<2x16xf32, #tpu.memory_space<vmem>>, vector<2x16xf32>
      tpu.vector_store %arg5[%c0_34, %c0_35], %57 {strides = array<i32>} : memref<2x16xf32, #tpu.memory_space<vmem>>, vector<2x16xf32>,
    } else {
    }
    return
  }
  func.func @transform_0(%arg0: i32) -> (i32, i32) {
    %c0_i32 = arith.constant 0 : i32
    %c0_i32_0 = arith.constant 0 : i32
    return %c0_i32, %arg0 : i32, i32
  }
  func.func @transform_1(%arg0: i32) -> (i32, i32) {
    %c0_i32 = arith.constant 0 : i32
    %c0_i32_0 = arith.constant 0 : i32
    return %arg0, %c0_i32 : i32, i32
  }
  func.func @transform_2(%arg0: i32) -> (i32, i32) {
    %c0_i32 = arith.constant 0 : i32
    %c0_i32_0 = arith.constant 0 : i32
    %c0_i32_1 = arith.constant 0 : i32
    return %c0_i32, %c0_i32_0 : i32, i32
  }
  func.func @transform_3(%arg0: i32) -> (i32, i32) {
    %c0_i32 = arith.constant 0 : i32
    %c0_i32_0 = arith.constant 0 : i32
    %c0_i32_1 = arith.constant 0 : i32
    return %c0_i32, %c0_i32_0 : i32, i32
  }
  func.func @transform_4(%arg0: i32) -> (i32, i32) {
    %c0_i32 = arith.constant 0 : i32
    %c0_i32_0 = arith.constant 0 : i32
    %c0_i32_1 = arith.constant 0 : i32
    return %c0_i32, %c0_i32_0 : i32, i32
  }
}

</mosaic_0001>

<bundles_post_ra>
// kernel: tpu_custom_call.1
= control target key start
LH: loop header
LB: loop body
LE: loop exit
PB: predicated region body
PF: predicated region fallthrough
CT: control target
= control target key end

     0   :  { %9 = vsyncpa [#allocation5], 0  ;;  %s675_s0 = inlined_call_operand.hbm [shape: s32[1,16], index: 0, kind: input, shape index: {}]   ;;  %s676_s1 = inlined_call_operand.hbm [shape: f32[16,16], index: 1, kind: input, shape index: {}]   ;;  %s677_s2 = inlined_call_operand.hbm [shape: f32[16,32], index: 2, kind: input, shape index: {}]   ;;  %s678_s3 = inlined_call_operand.vmem [shape: f32[1,32], index: 3, kind: input, shape index: {}]   ;;  %s679_s4 = inlined_call_operand.hbm [shape: f32[2,16], index: 4, kind: output, shape index: {}]  }
   0x1   :  { %10 = vsyncpa [#allocation8], 0 }
   0x2   :  { %11 = vsyncpa [#allocation6], 0  ;;  %s569_s15 = smov [#allocation7]   ;;  %s475_s19 = scalar_lea.hbm %s676_s1, 256 }
   0x3   :  { %s27_s16 = sshll.u32 %s569_s15, 4  ;;  %p476_p0 = scmp.ne.s32.totalorder %s676_s1, %s475_s19  ;;  %s28_s16 = int_to_ptr.vmem [resolvable:$true] %s27_s16 }
   0x4   :  { %p479_p1 = scmp.lt.u32.totalorder %s475_s19, %s676_s1 }
   0x6   :  { %p481_p2 = pnand %p479_p1, %p476_p0 }
   0x8   :  { %484 = shalt.err (!%p481_p2)
}
   0x9   :  { %s485_s24 = scalar_lea.vmem %s28_s16, 256  ;;  %p490_p4 = scmp.lt.s32.totalorder %s28_s16, %s28_s16 }
   0xa   :  { %p486_p3 = scmp.ne.s32.totalorder %s28_s16, %s485_s24  ;;  %p491_p5 = scmp.lt.s32.totalorder %s485_s24, %s485_s24 }
   0xc   :  { %p492_p6 = por %p491_p5, %p490_p4 }
   0xe   :  { %p493_p7 = pnand %p492_p6, %p486_p3 }
  0x10   :  { %496 = shalt.err (!%p493_p7)
}
  0x11   :  { %s570_s25 = smov 128   ;;  %s571_s26 = smov 8  }
  0x12   :  { %33 = dma.hbm_to_vmem [thread:$0]  %s676_s1, 256, %s28_s16, [#allocation8], %s570_s25, %s570_s25, %s571_s26  }
  0x13   :  { %s572_s29 = smov [#allocation4]   ;;  %s573_s5 = smov [#allocation9]  }
  0x14   :  { %s18_s30 = sshll.u32 %s572_s29, 4  ;;  %s39_s6 = sshll.u32 %s573_s5, 4  ;;  %s19_s30 = int_to_ptr.vmem [resolvable:$true] %s18_s30  ;;  %s40_s6 = int_to_ptr.vmem [resolvable:$true] %s39_s6 }
  0x15   :  { %s497_s9 = scalar_lea.hbm %s675_s0, 16 }
  0x16   :  { %p498_p8 = scmp.ne.s32.totalorder %s675_s0, %s497_s9  ;;  %p501_p9 = scmp.lt.u32.totalorder %s497_s9, %s675_s0 }
  0x18   :  { %p503_p10 = pnand %p501_p9, %p498_p8 }
  0x1a   :  { %506 = shalt.err (!%p503_p10)
}
  0x1b   :  { %s507_s1 = scalar_lea.vmem %s19_s30, 16  ;;  %s511_s14 = scalar_lea.vmem %s19_s30, 32 }
  0x1c   :  { %p508_p11 = scmp.ne.s32.totalorder %s19_s30, %s507_s1  ;;  %p512_p12 = scmp.lt.s32.totalorder %s19_s30, %s19_s30 }
  0x1d   :  { %p513_p13 = scmp.lt.s32.totalorder %s511_s14, %s507_s1 }
  0x1f   :  { %p514_p0 = por %p513_p13, %p512_p12 }
  0x21   :  { %p515_p1 = pnand %p514_p0, %p508_p11 }
  0x23   :  { %518 = shalt.err (!%p515_p1)
}
  0x24   :  { %21 = dma.hbm_to_vmem [thread:$0]  %s675_s0, 16, %s19_s30, [#allocation5]  }
  0x25   :  { %s519_s19 = scalar_lea.hbm %s677_s2, 256 }
  0x26   :  { %p520_p2 = scmp.ne.s32.totalorder %s677_s2, %s519_s19  ;;  %p523_p3 = scmp.lt.u32.totalorder %s519_s19, %s677_s2 }
  0x28   :  { %p525_p4 = pnand %p523_p3, %p520_p2 }
  0x2a   :  { %528 = shalt.err (!%p525_p4)
}
  0x2b   :  { %s529_s24 = scalar_lea.vmem %s40_s6, 256  ;;  %p534_p6 = scmp.lt.s32.totalorder %s40_s6, %s40_s6 }
  0x2c   :  { %p530_p5 = scmp.ne.s32.totalorder %s40_s6, %s529_s24  ;;  %p535_p7 = scmp.lt.s32.totalorder %s529_s24, %s529_s24 }
  0x2e   :  { %p536_p8 = por %p535_p7, %p534_p6 }
  0x30   :  { %p537_p9 = pnand %p536_p8, %p530_p5 }
  0x32   :  { %540 = shalt.err (!%p537_p9)
}
  0x33   :  { %45 = dma.hbm_to_vmem [thread:$0]  %s677_s2, 256, %s40_s6, [#allocation8], %s570_s25, %s570_s25, %s571_s26  }
  0x34   :  { %563 = dma.done.wait [#allocation5], 16  }
  0x35   :  { %564 = vsyncadd [#allocation5], 4294967280 }
  0x36   :  { %565 = dma.done.wait [#allocation8], 512  }
  0x37   :  { %566 = vsyncadd [#allocation8], 4294966784  ;;  %vm70_vm0 = vcmask 130048   ;;  %v68_v0 = vld [vmem:[#allocation9] sm:$0xff]  ;;  %v69_v1 = vld [vmem:[#allocation9 + $0x8] sm:$0xff]  ;;  %v574_v6 = vmov 0.0|0.0   ;;  %v236_v15 = vlaneseq }
  0x38   :  { %v66_v2 = vld [vmem:[#allocation7] sm:$0xff]  ;;  %v441_v3 = vpack.c.bf16 %v69_v1, %v68_v0  ;;  %v67_v4 = vld [vmem:[#allocation7 + $0x8] sm:$0xff]  ;;  %445 = vmatprep.subr.bf16.mxu1 %v574_v6  ;;  %vm61_vm1 = vcmask 1024   ;;  %v575_v7 = vmov 0.0   ;;  %vm576_vm2 = vmmov 0  }
  0x39   :  { %424 = vmatprep.mubr.msk.f32.mxu0 %vm70_vm0, %v66_v2  ;;  %v450_v5 = vpack.c.bf16 %v67_v4, %v66_v2  ;;  %63 = vst.msk [vmem:[#allocation3] sm:$0x3] %vm61_vm1, %v575_v7  ;;  %431 = vmatprep.mubr.msk.f32.mxu1 %vm576_vm2, %v575_v7  ;;  %vm155_vm3 = vcmask 261120   ;;  %v154_v13 = vld [vmem:[%s678_s3] sm:$0x1]  ;;  %vm64_vm5 = vcmask 123904  }
  0x3a   :  { %442 = vmatprep.subr.bf16.mxu0 %v441_v3  ;;  %vm447_vm4 = vmpackc.low %vm155_vm3, %vm155_vm3  ;;  %65 = vst.msk [vmem:[#allocation10] sm:$0x3] %vm64_vm5, %v575_v7  ;;  %v577_v14 = vmov -1e+30   ;;  %v237_v16 = vshrl.u32 %v236_v15, 7  ;;  %v578_v24 = vmov 0  }
  0x3b   :  { %444 = vmatpush3.bf16.msra.mxu0 %v441_v3  ;;  %62 = vst.msk [vmem:[#allocation2] sm:$0x3] %vm61_vm1, %v577_v14  ;;  %v407_v18 = vld [vmem:[#allocation4] ss:$0 sm:$0xff]  ;;  %463 = vset.pattern.permute.xlu0 %v578_v24  ;;  %s579_s3 = smov [#allocation10]  }
  0x3c   :  { %449 = vmatprep.subr.bf16.mxu0 %v574_v6  ;;  %v247_v17 = vsub.s32 0, %v237_v16  ;;  %vm242_vm6 = vcmp.eq.s32.totalorder %v407_v18, %v237_v16  ;;  %464 = vset.pattern.permute.xlu1 %v578_v24  ;;  %s392_s26 = sshll.u32 %s579_s3, 4  ;;  %s393_s26 = int_to_ptr.vmem [resolvable:$true] %s392_s26 }
  0x3d   :  { %v408_v29 = vsel %vm242_vm6, 1.0, %v575_v7  ;;  %s541_s28 = scalar_lea.vmem %s393_s26, 32  ;;  %p546_p11 = scmp.lt.s32.totalorder %s393_s26, %s393_s26 }
  0x3e   :  { %425 = vmatmul.mubr.msk.f32.vlgmr.msra.gmra.mrb[0].mxu0 %vm70_vm0, %v67_v4  ;;  %p542_p10 = scmp.ne.s32.totalorder %s393_s26, %s541_s28  ;;  %p547_p12 = scmp.lt.s32.totalorder %s541_s28, %s541_s28 }
  0x3f   :  { %451 = vmatpush3.bf16.msra.mxu0 %v450_v5  ;;  %438 = vmatprep.mubr.msk.f32.mxu0 %vm576_vm2, %v575_v7 }
  0x40   :  { %v282_v47 = vld [vmem:[#allocation3] sm:$0x3]  ;;  %p548_p13 = por %p547_p12, %p546_p11 }
  0x41   :  { %v289_v54 = vld [vmem:[#allocation10] sm:$0x3] }
  0x42   :  { %v254_v25 = vld [vmem:[#allocation2] sm:$0x3]  ;;  %p549_p0 = pnand %p548_p13, %p542_p10 }
 0x111   :  { %v426_v8 = vpop.f32.mrb[0].mxu0 }
 0x112   :  { %465 = vtanh.f32 %v426_v8  ;;  %v143_v9 = vpop.f32.mrb[1].mxu0 }
 0x113   :  { %467 = vtanh.f32 %v143_v9 }
 0x11c   :  { %v466_v10 = vpop.eup %465 }
 0x11d   :  { %v468_v11 = vpop.eup %467 }
 0x11e   :  { %v446_v12 = vpack.c.bf16 %v466_v10, %v468_v11 }
 0x120   :  { %448 = vmatpush3.bf16.xpose.msk.msra.mxu1 %vm447_vm4, %v446_v12 }
 0x127   :  { %432 = vmatmul.mubr.msk.f32.vlgmr.msra.gmra.mrb[0].mxu1 %vm155_vm3, %v154_v13 }
 0x1fa   :  { %v231_v19 = vpop.f32.mrb[0].mxu1 }
 0x1fb   :  { %v248_v20 = vrot.slane %v231_v19, %v247_v17  ;;  %v433_v21 = vpop.f32.mrb[1].mxu1 }
 0x1fd   :  { %v249_v22 = vsel %vm242_vm6, %v248_v20, -1e+30 }
 0x1fe   :  { %v251_v23 = vsel %vm64_vm5, %v249_v22, -inf }
 0x1ff   :  { %252 = vmax.xlane.f32.xlu0 %v251_v23 }
 0x28c   :  { %v253_v26 = vpop.xlane.xlu0 %252 }
 0x28d   :  { %v255_v27 = vmax.f32 %v254_v25, %v253_v26 }
 0x28f   :  { %v256_v28 = vsub.f32 %v254_v25, %v255_v27  ;;  %281 = vst.msk [vmem:[#allocation2] sm:$0x3] %vm61_vm1, %v255_v27  ;;  %261 = vperm.xlu0 %463, %v255_v27  }
 0x291   :  { %v257_v45 = vmul.f32 1.442695, %v256_v28 }
 0x30e   :  { %v262_v30 = vpop.permute.xlu0 %261 }
 0x30f   :  { %v264_v31 = vmul.f32 %v408_v29, %v262_v30 }
 0x311   :  { %v265_v32 = vsel %vm64_vm5, %v264_v31, 0.0 }
 0x312   :  { %v266_v33 = vrot.slane %v265_v32, 4 }
 0x314   :  { %v267_v34 = vadd.f32 %v266_v33, %v265_v32 }
 0x316   :  { %v268_v35 = vrot.slane %v267_v34, 2 }
 0x318   :  { %v269_v36 = vadd.f32 %v268_v35, %v267_v34 }
 0x31a   :  { %v270_v37 = vrot.slane %v269_v36, 1 }
 0x31c   :  { %v271_v38 = vadd.f32 %v270_v37, %v269_v36 }
 0x31e   :  { %v272_v39 = vsub.f32 %v231_v19, %v271_v38 }
 0x320   :  { %v273_v40 = vmul.f32 1.442695, %v272_v39 }
 0x322   :  { %469 = vpow2.f32 %v273_v40 }
 0x323   :  { %471 = vpow2.f32 %v257_v45 }
 0x32c   :  { %v470_v41 = vpop.eup %469 }
 0x32d   :  { %v278_v42 = vrot.slane %v470_v41, %v247_v17  ;;  %v472_v46 = vpop.eup %471 }
 0x32e   :  { %v283_v48 = vmul.f32 %v472_v46, %v282_v47 }
 0x32f   :  { %v279_v43 = vmul.f32 %v408_v29, %v278_v42 }
 0x331   :  { %439 = vmatmul.mubr.msk.f32.vlgmr.msra.gmra.mrb[2].mxu0 %vm70_vm0, %v279_v43  ;;  %v284_v44 = vsel %vm64_vm5, %v279_v43, 0.0 }
 0x332   :  { %285 = vadd.xlane.f32.xlu1 %v284_v44 }
 0x343   :  { %292 = vperm.xlu1 %464, %v472_v46  }
 0x3bf   :  { %v286_v49 = vpop.xlane.xlu1 %285 }
 0x3c0   :  { %v287_v50 = vadd.f32 %v286_v49, %v283_v48 }
 0x3c2   :  { %288 = vst.msk [vmem:[#allocation3] sm:$0x3] %vm61_vm1, %v287_v50 }
 0x3c3   :  { %v293_v55 = vpop.permute.xlu1 %292 }
 0x3c4   :  { %v295_v56 = vmul.f32 %v293_v55, %v289_v54 }
 0x3c9   :  { %v374_v51 = vld [vmem:[#allocation3] sm:$0x3] }
 0x3ca   :  { %vm375_vm7 = vcmp.gt.f32.partialorder %v374_v51, 0.0 }
 0x3cb   :  { %v376_v52 = vsel %vm375_vm7, %v374_v51, 1.0 }
 0x3cc   :  { %473 = vrcp.f32 %v376_v52 }
 0x3d6   :  { %v474_v53 = vpop.eup %473 }
 0x3d7   :  { %381 = vperm.xlu1 %464, %v474_v53  }
 0x404   :  { %v365_v57 = vpop.f32.mrb[2].mxu0 }
 0x405   :  { %v369_v58 = vadd.f32 %v365_v57, %v295_v56  ;;  %v440_v59 = vpop.f32.mrb[3].mxu0 }
 0x407   :  { %370 = vst.msk [vmem:[#allocation10] sm:$0x3] %vm64_vm5, %v369_v58 }
 0x40e   :  { %v377_v60 = vld [vmem:[#allocation10] sm:$0x3] }
 0x456   :  { %v382_v61 = vpop.permute.xlu1 %381 }
 0x457   :  { %v384_v62 = vmul.f32 %v382_v61, %v377_v60 }
 0x459   :  { %385 = vst.msk [vmem:[#allocation10] sm:$0x3] %vm64_vm5, %v384_v62 }
 0x45a   :  { %552 = shalt.err (!%p549_p0)
}
 0x45b   :  { %s553_s5 = scalar_lea.hbm %s679_s4, 32 }
 0x45c   :  { %p554_p1 = scmp.ne.s32.totalorder %s679_s4, %s553_s5  ;;  %p557_p2 = scmp.lt.u32.totalorder %s553_s5, %s679_s4 }
 0x45e   :  { %p559_p3 = pnand %p557_p2, %p554_p1 }
 0x460   :  { %562 = shalt.err (!%p559_p3)
}
 0x461   :  { %395 = dma.vmem_to_hbm [thread:$0]  %s393_s26, 32, %s679_s4, [#allocation6]  }
 0x462   :  { %567 = dma.done.wait [#allocation6], 32  }
 0x463   :  { %568 = vsyncadd [#allocation6], 4294967264 }
 0x464   :  { %399 = vsyncpa [#allocation5], 1 }
 0x465   :  { %400 = vsyncpa [#allocation8], 1 }
 0x466   :  { %401 = vsyncpa [#allocation6], 1 }

</bundles_post_ra>
